<compile_context>
chip_gen: v6e
topology: v6e:2x2x1
jax: 0.10.0
libtpu: 0.0.40
codegen_flags: <defaults>
</compile_context>

<pallas_src>
import numpy as np
import jax
import jax.numpy as jnp
from jax import lax
from jax.experimental import pallas as pl
from jax.experimental.pallas import tpu as pltpu

_VMEM_LIMIT = 32 * 1024 * 1024


# ---------------------------------------------------------------------------
# Host-side bilinear helpers (PyTorch align_corners=False formula).
# ---------------------------------------------------------------------------
def _bilinear_taps(n_in, n_out):
    i = np.arange(n_out, dtype=np.float64)
    src = np.maximum((i + 0.5) * (n_in / n_out) - 0.5, 0.0)
    i0 = np.minimum(np.floor(src), n_in - 1).astype(np.int64)
    i1 = np.minimum(i0 + 1, n_in - 1)
    w1 = (src - i0).astype(np.float32)
    w0 = (1.0 - w1).astype(np.float32)
    return i0.astype(np.int32), i1.astype(np.int32), w0, w1


def _bilinear_matrix(n_in, n_out):
    i0, i1, w0, w1 = _bilinear_taps(n_in, n_out)
    m = np.zeros((n_out, n_in), np.float32)
    np.add.at(m, (np.arange(n_out), i0), w0)
    np.add.at(m, (np.arange(n_out), i1), w1)
    return m


def _pick_half_row_tile(hh, wh, c):
    """Half-res rows handled per grid step of kernel A (~128 KiB per x block)."""
    target = max(1, (128 * 1024) // max(1, wh * 2 * c * 4))
    for d in range(min(target, hh), 0, -1):
        if hh % d == 0:
            return d
    return hh


def _pick_spatial_chunk(n_pix, c):
    """Flattened full-res pixels handled per grid step of kernel B (~512 KiB x block)."""
    target = max(8, (512 * 1024) // max(1, c * 4))
    for d in range(min(target, n_pix), 0, -1):
        if n_pix % d == 0 and d % 8 == 0:
            return d
    return n_pix


# ---------------------------------------------------------------------------
# Kernel A: half-resolution attention map.
# ---------------------------------------------------------------------------
def attn_map_kernel(i0_ref, i1_ref, w0_ref, w1_ref, psib_ref,   # scalar prefetch (SMEM)
                    xe_ref, xo_ref, g_ref,
                    we_ref, wo_ref, phiw_ref, phib_ref, rwh_ref, psiw_ref,
                    s_ref,                                       # out (THh, Wh, 1)
                    pg_scr):                                     # VMEM (Hg, Wg, C)
    t = pl.program_id(1)
    thh = s_ref.shape[0]
    hg = g_ref.shape[0]

    # Hoist small weights out of the row loop.
    phiw = phiw_ref[...]
    phib = phib_ref[...]
    we = we_ref[...]
    wo = wo_ref[...]
    rwh = rwh_ref[...]
    psiw = psiw_ref[...]
    psib = psib_ref[0]

    # phi: 1x1 conv (Cg -> C) on the (small) gating signal, one g-row at a time.
    for gi in range(hg):
        pg_scr[gi] = (jnp.dot(g_ref[gi], phiw, preferred_element_type=jnp.float32)
                      + phib)

    def row_body(r, carry):
        rg = t * thh + r                                   # global half-res row index
        a0 = i0_ref[rg]
        a1 = i1_ref[rg]
        u0 = w0_ref[rg]
        u1 = w1_ref[rg]
        # Separable bilinear upsample of phi(g) for this half-res row:
        # height = 2-tap weighted sum, width = small matmul.
        phi_row = u0 * pg_scr[a0] + u1 * pg_scr[a1]                            # (Wg, C)
        phi_up = jnp.dot(rwh, phi_row, preferred_element_type=jnp.float32)     # (Wh, C)
        # theta(theta_(x)): 2x2/stride-2 depthwise conv folded into two (2C->C) matmuls.
        th = (jnp.dot(xe_ref[r], we, preferred_element_type=jnp.float32)
              + jnp.dot(xo_ref[r], wo, preferred_element_type=jnp.float32))    # (Wh, C)
        f = jnp.maximum(th + phi_up, 0.0)
        logit = jnp.sum(f * psiw, axis=-1, keepdims=True) + psib               # (Wh, 1)
        s_ref[r] = jax.nn.sigmoid(logit)
        return carry

    lax.fori_loop(0, thh, row_body, 0)


# ---------------------------------------------------------------------------
# Kernel B: full-resolution streaming pass (attention * x, then folded conv+BN).
# ---------------------------------------------------------------------------
def apply_attn_kernel(x_ref, s_ref, w_ref, b_ref, o_ref):
    y = s_ref[...] * x_ref[...]                                   # (CH, 1) * (CH, C)
    o_ref[...] = (jnp.dot(y, w_ref[...], preferred_element_type=jnp.float32)
                  + b_ref[...]).astype(o_ref.dtype)


# ---------------------------------------------------------------------------
# Parameters & preprocessing.
# ---------------------------------------------------------------------------
def init_params(key, C, Cg):
    ks = jax.random.split(key, 11)
    return dict(
        W_w=0.2 * jax.random.normal(ks[0], (C, C), jnp.float32),
        bn_gamma=1.0 + 0.1 * jax.random.normal(ks[1], (C,), jnp.float32),
        bn_beta=0.1 * jax.random.normal(ks[2], (C,), jnp.float32),
        bn_mean=0.1 * jax.random.normal(ks[3], (C,), jnp.float32),
        bn_var=0.5 + jnp.abs(jax.random.normal(ks[4], (C,), jnp.float32)),
        theta_dw=0.3 * jax.random.normal(ks[5], (C, 2, 2), jnp.float32),
        theta_w=0.3 * jax.random.normal(ks[6], (C, C), jnp.float32),
        phi_w=0.2 * jax.random.normal(ks[7], (C, Cg), jnp.float32),
        phi_b=0.1 * jax.random.normal(ks[8], (C,), jnp.float32),
        psi_w=0.3 * jax.random.normal(ks[9], (1, C), jnp.float32),
        psi_b=0.1 * jax.random.normal(ks[10], (1,), jnp.float32),
    )


def prepare(params, H, W, Hg, Wg):
    C = params["theta_w"].shape[0]
    Hh, Wh = H // 2, W // 2
    eps = 1e-5
    scale = params["bn_gamma"] / jnp.sqrt(params["bn_var"] + eps)

    dw = params["theta_dw"]                       # (C, 2, 2)
    thw = params["theta_w"].T                     # (C_in, C_out)
    # Fold depthwise taps into the following 1x1 conv: lane-dense (2C -> C) weights.
    we = jnp.concatenate([dw[:, 0, 0][:, None] * thw, dw[:, 0, 1][:, None] * thw], axis=0)
    wo = jnp.concatenate([dw[:, 1, 0][:, None] * thw, dw[:, 1, 1][:, None] * thw], axis=0)

    i0, i1, w0, w1 = _bilinear_taps(Hg, Hh)
    return dict(
        we=we, wo=wo,                                              # (2C, C)
        phi_wT=params["phi_w"].T,                                  # (Cg, C)
        phi_b=params["phi_b"][None, :],                            # (1, C)
        psi_w=params["psi_w"],                                     # (1, C)
        psi_b=params["psi_b"],                                     # (1,)
        rw_half=jnp.asarray(_bilinear_matrix(Wg, Wh)),             # (Wh, Wg)
        row_i0=jnp.asarray(i0), row_i1=jnp.asarray(i1),
        row_w0=jnp.asarray(w0), row_w1=jnp.asarray(w1),
        rh_full=jnp.asarray(_bilinear_matrix(Hh, H)),              # (H, Hh)
        rw_full=jnp.asarray(_bilinear_matrix(Wh, W)),              # (W, Wh)
        w_eff=params["W_w"].T * scale[None, :],                    # conv + BN folded
        b_eff=(params["bn_beta"] - params["bn_mean"] * scale)[None, :],
    )


# ---------------------------------------------------------------------------
# Forward pass (PyTorch NCHW in / NCHW out).
# ---------------------------------------------------------------------------
def add_attn_forward(x_nchw, g_nchw, params, *, half_row_tile=None, spatial_chunk=None):
    B, C, H, W = x_nchw.shape
    _, Cg, Hg, Wg = g_nchw.shape
    if H % 2 or W % 2:
        raise ValueError("H and W must be even (2x2/stride-2 theta_ conv).")
    Hh, Wh = H // 2, W // 2
    C2 = 2 * C
    p = prepare(params, H, W, Hg, Wg)

    # NCHW -> NHWC layout glue (free reshapes after that).
    x_nhwc = jnp.transpose(x_nchw, (0, 2, 3, 1))
    g_nhwc = jnp.transpose(g_nchw, (0, 2, 3, 1))
    x_re = x_nhwc.reshape(B, Hh, 2, Wh, C2)        # (b, hh, row-parity, wh, 2C)
    x_flat = x_nhwc.reshape(B, H * W, C)

    thh = half_row_tile or _pick_half_row_tile(Hh, Wh, C)
    if Hh % thh:
        raise ValueError("half_row_tile must divide H//2")
    ch = spatial_chunk or _pick_spatial_chunk(H * W, C)
    if (H * W) % ch or (ch % 8 and ch != H * W):
        raise ValueError("spatial_chunk must divide H*W and be a multiple of 8")

    # ---- pass 1: half-resolution attention map -------------------------------
    xe_spec = pl.BlockSpec((None, thh, None, Wh, C2), lambda b, t, *_: (b, t, 0, 0, 0))
    xo_spec = pl.BlockSpec((None, thh, None, Wh, C2), lambda b, t, *_: (b, t, 1, 0, 0))
    g_spec = pl.BlockSpec((None, Hg, Wg, Cg), lambda b, t, *_: (b, 0, 0, 0))

    def wspec(shape):
        return pl.BlockSpec(shape, lambda b, t, *_: (0, 0))

    grid_spec = pltpu.PrefetchScalarGridSpec(
        num_scalar_prefetch=5,
        grid=(B, Hh // thh),
        in_specs=[xe_spec, xo_spec, g_spec,
                  wspec((C2, C)), wspec((C2, C)),
                  wspec((Cg, C)), wspec((1, C)),
                  wspec((Wh, Wg)), wspec((1, C))],
        out_specs=pl.BlockSpec((None, thh, Wh, 1), lambda b, t, *_: (b, t, 0, 0)),
        scratch_shapes=[pltpu.VMEM((Hg, Wg, C), jnp.float32)],
    )
    s_half = pl.pallas_call(
        attn_map_kernel,
        out_shape=jax.ShapeDtypeStruct((B, Hh, Wh, 1), jnp.float32),
        grid_spec=grid_spec,
        compiler_params=pltpu.CompilerParams(
            dimension_semantics=("parallel", "parallel"),
            vmem_limit_bytes=_VMEM_LIMIT),
    )(p["row_i0"], p["row_i1"], p["row_w0"], p["row_w1"], p["psi_b"],
      x_re, x_re, g_nhwc,
      p["we"], p["wo"], p["phi_wT"], p["phi_b"], p["rw_half"], p["psi_w"])

    # Tiny 1-channel separable bilinear upsample of the attention map (XLA glue,
    # ~1/C of the x HBM traffic).
    s_full = jnp.einsum("rh,bhw,cw->brc",
                        p["rh_full"], s_half.reshape(B, Hh, Wh), p["rw_full"],
                        precision=lax.Precision.HIGHEST).reshape(B, H * W, 1)

    # ---- pass 2: streaming full-resolution apply + folded conv/BN -------------
    flops = 2 * B * H * W * C * C + B * H * W * C
    bytes_accessed = 4 * (2 * B * H * W * C + B * H * W + C * C + C)
    out_flat = pl.pallas_call(
        apply_attn_kernel,
        out_shape=jax.ShapeDtypeStruct((B, H * W, C), jnp.float32),
        grid=(B, (H * W) // ch),
        in_specs=[
            pl.BlockSpec((None, ch, C), lambda b, t: (b, t, 0)),
            pl.BlockSpec((None, ch, 1), lambda b, t: (b, t, 0)),
            pl.BlockSpec((C, C), lambda b, t: (0, 0)),
            pl.BlockSpec((1, C), lambda b, t: (0, 0)),
        ],
        out_specs=pl.BlockSpec((None, ch, C), lambda b, t: (b, t, 0)),
        compiler_params=pltpu.CompilerParams(
            dimension_semantics=("parallel", "parallel"),
            vmem_limit_bytes=_VMEM_LIMIT),
        cost_estimate=pl.CostEstimate(flops=flops, transcendentals=0,
                                      bytes_accessed=bytes_accessed),
    )(x_flat, s_full, p["w_eff"], p["b_eff"])

    return out_flat.reshape(B, H, W, C).transpose(0, 3, 1, 2)


# ---------------------------------------------------------------------------
# Pure-JAX reference (same math, no Pallas).
# ---------------------------------------------------------------------------
def reference_forward(x_nchw, g_nchw, params):
    B, C, H, W = x_nchw.shape
    _, Cg, Hg, Wg = g_nchw.shape
    Hh, Wh = H // 2, W // 2
    hp = lax.Precision.HIGHEST

    x = jnp.transpose(x_nchw, (0, 2, 3, 1))
    g = jnp.transpose(g_nchw, (0, 2, 3, 1))

    dw = params["theta_dw"]
    theta_ = sum(x[:, ti::2, tj::2, :] * dw[:, ti, tj]
                 for ti in (0, 1) for tj in (0, 1))
    theta_x = jnp.einsum("bhwc,dc->bhwd", theta_, params["theta_w"], precision=hp)

    phi_g = jnp.einsum("bhwc,dc->bhwd", g, params["phi_w"], precision=hp) + params["phi_b"]
    mh = jnp.asarray(_bilinear_matrix(Hg, Hh))
    mw = jnp.asarray(_bilinear_matrix(Wg, Wh))
    phi_up = jnp.einsum("rh,bhwc,sw->brsc", mh, phi_g, mw, precision=hp)

    f = jax.nn.relu(theta_x + phi_up)
    s = jax.nn.sigmoid(jnp.einsum("bhwc,oc->bhwo", f, params["psi_w"], precision=hp)
                       + params["psi_b"])
    mh2 = jnp.asarray(_bilinear_matrix(Hh, H))
    mw2 = jnp.asarray(_bilinear_matrix(Wh, W))
    s_up = jnp.einsum("rh,bhwo,sw->brso", mh2, s, mw2, precision=hp)

    y = s_up * x
    eps = 1e-5
    scale = params["bn_gamma"] / jnp.sqrt(params["bn_var"] + eps)
    out = (jnp.einsum("bhwc,dc->bhwd", y, params["W_w"], precision=hp) * scale
           + (params["bn_beta"] - params["bn_mean"] * scale))
    return out.transpose(0, 3, 1, 2)


if __name__ == "__main__":
    B, C, Cg = 2, 4, 8
    H = W = 16
    Hg = Wg = 4

    key = jax.random.PRNGKey(0)
    kx, kg, kp = jax.random.split(key, 3)
    x = jax.random.normal(kx, (B, C, H, W), jnp.float32)     # NCHW, like PyTorch
    g = jax.random.normal(kg, (B, Cg, Hg, Wg), jnp.float32)  # NCHW gating signal
    params = init_params(kp, C, Cg)

    # Small tile sizes so the test actually exercises the multi-tile grids.
    out = add_attn_forward(x, g, params, half_row_tile=4, spatial_chunk=64)
    out = jax.block_until_ready(out)

    ref = reference_forward(x, g, params)
    assert out.shape == (B, C, H, W), out.shape
    err = float(jnp.max(jnp.abs(out - ref)))
    assert err < 1e-4, err
    print("KERNEL_OK")
</pallas_src>

<mosaic_0001>
module attributes {stable_mosaic.version = 11 : i64} {
  func.func @attn_map_kernel(%arg0: i32, %arg1: i32, %arg2: memref<8xi32, #tpu.memory_space<smem>>, %arg3: memref<8xi32, #tpu.memory_space<smem>>, %arg4: memref<8xf32, #tpu.memory_space<smem>>, %arg5: memref<8xf32, #tpu.memory_space<smem>>, %arg6: memref<1xf32, #tpu.memory_space<smem>>, %arg7: memref<1x4x1x8x8xf32, #tpu.memory_space<vmem>>, %arg8: memref<1x4x1x8x8xf32, #tpu.memory_space<vmem>>, %arg9: memref<1x4x4x8xf32, #tpu.memory_space<vmem>>, %arg10: memref<8x4xf32, #tpu.memory_space<vmem>>, %arg11: memref<8x4xf32, #tpu.memory_space<vmem>>, %arg12: memref<8x4xf32, #tpu.memory_space<vmem>>, %arg13: memref<1x4xf32, #tpu.memory_space<vmem>>, %arg14: memref<8x4xf32, #tpu.memory_space<vmem>>, %arg15: memref<1x4xf32, #tpu.memory_space<vmem>>, %arg16: memref<1x4x8x1xf32, #tpu.memory_space<vmem>>, %arg17: memref<4x4x4xf32, #tpu.memory_space<vmem>>) attributes {dimension_semantics = [#tpu.dimension_semantics<parallel>, #tpu.dimension_semantics<parallel>], iteration_bounds = array<i64: 2, 2>, scalar_prefetch = 5 : i64, scratch_operands = 1 : i64, tpu.core_type = #tpu.core_type<tc>, window_params = [{transform_indices = @transform_0, window_bounds = array<i64: 1, 4, 1, 8, 8>}, {transform_indices = @transform_1, window_bounds = array<i64: 1, 4, 1, 8, 8>}, {transform_indices = @transform_2, window_bounds = array<i64: 1, 4, 4, 8>}, {pipeline_mode = #tpu.pipeline_mode<synchronous>, transform_indices = @transform_3, window_bounds = array<i64: 8, 4>}, {pipeline_mode = #tpu.pipeline_mode<synchronous>, transform_indices = @transform_4, window_bounds = array<i64: 8, 4>}, {pipeline_mode = #tpu.pipeline_mode<synchronous>, transform_indices = @transform_5, window_bounds = array<i64: 8, 4>}, {pipeline_mode = #tpu.pipeline_mode<synchronous>, transform_indices = @transform_6, window_bounds = array<i64: 1, 4>}, {pipeline_mode = #tpu.pipeline_mode<synchronous>, transform_indices = @transform_7, window_bounds = array<i64: 8, 4>}, {pipeline_mode = #tpu.pipeline_mode<synchronous>, transform_indices = @transform_8, window_bounds = array<i64: 1, 4>}, {transform_indices = @transform_9, window_bounds = array<i64: 1, 4, 8, 1>}]} {
    %c0 = arith.constant 0 : index
    %c0_0 = arith.constant 0 : index
    %0 = vector.load %arg12[%c0, %c0_0] : memref<8x4xf32, #tpu.memory_space<vmem>>, vector<8x4xf32>
    %c0_1 = arith.constant 0 : index
    %c0_2 = arith.constant 0 : index
    %1 = vector.load %arg13[%c0_1, %c0_2] : memref<1x4xf32, #tpu.memory_space<vmem>>, vector<1x4xf32>
    %c0_3 = arith.constant 0 : index
    %c0_4 = arith.constant 0 : index
    %2 = vector.load %arg10[%c0_3, %c0_4] : memref<8x4xf32, #tpu.memory_space<vmem>>, vector<8x4xf32>
    %c0_5 = arith.constant 0 : index
    %c0_6 = arith.constant 0 : index
    %3 = vector.load %arg11[%c0_5, %c0_6] : memref<8x4xf32, #tpu.memory_space<vmem>>, vector<8x4xf32>
    %c0_7 = arith.constant 0 : index
    %c0_8 = arith.constant 0 : index
    %4 = vector.load %arg14[%c0_7, %c0_8] : memref<8x4xf32, #tpu.memory_space<vmem>>, vector<8x4xf32>
    %c0_9 = arith.constant 0 : index
    %c0_10 = arith.constant 0 : index
    %5 = vector.load %arg15[%c0_9, %c0_10] : memref<1x4xf32, #tpu.memory_space<vmem>>, vector<1x4xf32>
    %c0_11 = arith.constant 0 : index
    %6 = memref.load %arg6[%c0_11] : memref<1xf32, #tpu.memory_space<smem>>
    %c0_12 = arith.constant 0 : index
    %c0_13 = arith.constant 0 : index
    %c0_14 = arith.constant 0 : index
    %c0_15 = arith.constant 0 : index
    %7 = vector.load %arg9[%c0_12, %c0_13, %c0_14, %c0_15] : memref<1x4x4x8xf32, #tpu.memory_space<vmem>>, vector<1x1x4x8xf32>
    %8 = vector.shape_cast %7 : vector<1x1x4x8xf32> to vector<4x8xf32>
    %cst = arith.constant dense<0.000000e+00> : vector<4x4xf32>
    %9 = tpu.matmul %8, %0, %cst {dimension_numbers = #tpu.dot_dimension_numbers<[1], [0], [0], [1], [0, 0, 1, 1], [], []>} : vector<4x8xf32>, vector<8x4xf32>, vector<4x4xf32> -> vector<4x4xf32>
    %10 = vector.broadcast %1 : vector<1x4xf32> to vector<4x4xf32>
    %11 = arith.addf %9, %10 : vector<4x4xf32>
    %c0_16 = arith.constant 0 : index
    %c0_17 = arith.constant 0 : index
    %c0_18 = arith.constant 0 : index
    %12 = vector.load %arg17[%c0_16, %c0_17, %c0_18] : memref<4x4x4xf32, #tpu.memory_space<vmem>>, vector<1x4x4xf32>
    %13 = vector.shape_cast %12 : vector<1x4x4xf32> to vector<4x4xf32>
    %14 = vector.shape_cast %11 : vector<4x4xf32> to vector<1x4x4xf32>
    tpu.vector_store %arg17[%c0_16, %c0_17, %c0_18], %14 {strides = array<i32>} : memref<4x4x4xf32, #tpu.memory_space<vmem>>, vector<1x4x4xf32>,
    %c0_19 = arith.constant 0 : index
    %c1 = arith.constant 1 : index
    %c0_20 = arith.constant 0 : index
    %c0_21 = arith.constant 0 : index
    %15 = vector.load %arg9[%c0_19, %c1, %c0_20, %c0_21] : memref<1x4x4x8xf32, #tpu.memory_space<vmem>>, vector<1x1x4x8xf32>
    %16 = vector.shape_cast %15 : vector<1x1x4x8xf32> to vector<4x8xf32>
    %cst_22 = arith.constant dense<0.000000e+00> : vector<4x4xf32>
    %17 = tpu.matmul %16, %0, %cst_22 {dimension_numbers = #tpu.dot_dimension_numbers<[1], [0], [0], [1], [0, 0, 1, 1], [], []>} : vector<4x8xf32>, vector<8x4xf32>, vector<4x4xf32> -> vector<4x4xf32>
    %18 = vector.broadcast %1 : vector<1x4xf32> to vector<4x4xf32>
    %19 = arith.addf %17, %18 : vector<4x4xf32>
    %c1_23 = arith.constant 1 : index
    %c0_24 = arith.constant 0 : index
    %c0_25 = arith.constant 0 : index
    %20 = vector.load %arg17[%c1_23, %c0_24, %c0_25] : memref<4x4x4xf32, #tpu.memory_space<vmem>>, vector<1x4x4xf32>
    %21 = vector.shape_cast %20 : vector<1x4x4xf32> to vector<4x4xf32>
    %22 = vector.shape_cast %19 : vector<4x4xf32> to vector<1x4x4xf32>
    tpu.vector_store %arg17[%c1_23, %c0_24, %c0_25], %22 {strides = array<i32>} : memref<4x4x4xf32, #tpu.memory_space<vmem>>, vector<1x4x4xf32>,
    %c0_26 = arith.constant 0 : index
    %c2 = arith.constant 2 : index
    %c0_27 = arith.constant 0 : index
    %c0_28 = arith.constant 0 : index
    %23 = vector.load %arg9[%c0_26, %c2, %c0_27, %c0_28] : memref<1x4x4x8xf32, #tpu.memory_space<vmem>>, vector<1x1x4x8xf32>
    %24 = vector.shape_cast %23 : vector<1x1x4x8xf32> to vector<4x8xf32>
    %cst_29 = arith.constant dense<0.000000e+00> : vector<4x4xf32>
    %25 = tpu.matmul %24, %0, %cst_29 {dimension_numbers = #tpu.dot_dimension_numbers<[1], [0], [0], [1], [0, 0, 1, 1], [], []>} : vector<4x8xf32>, vector<8x4xf32>, vector<4x4xf32> -> vector<4x4xf32>
    %26 = vector.broadcast %1 : vector<1x4xf32> to vector<4x4xf32>
    %27 = arith.addf %25, %26 : vector<4x4xf32>
    %c2_30 = arith.constant 2 : index
    %c0_31 = arith.constant 0 : index
    %c0_32 = arith.constant 0 : index
    %28 = vector.load %arg17[%c2_30, %c0_31, %c0_32] : memref<4x4x4xf32, #tpu.memory_space<vmem>>, vector<1x4x4xf32>
    %29 = vector.shape_cast %28 : vector<1x4x4xf32> to vector<4x4xf32>
    %30 = vector.shape_cast %27 : vector<4x4xf32> to vector<1x4x4xf32>
    tpu.vector_store %arg17[%c2_30, %c0_31, %c0_32], %30 {strides = array<i32>} : memref<4x4x4xf32, #tpu.memory_space<vmem>>, vector<1x4x4xf32>,
    %c0_33 = arith.constant 0 : index
    %c3 = arith.constant 3 : index
    %c0_34 = arith.constant 0 : index
    %c0_35 = arith.constant 0 : index
    %31 = vector.load %arg9[%c0_33, %c3, %c0_34, %c0_35] : memref<1x4x4x8xf32, #tpu.memory_space<vmem>>, vector<1x1x4x8xf32>
    %32 = vector.shape_cast %31 : vector<1x1x4x8xf32> to vector<4x8xf32>
    %cst_36 = arith.constant dense<0.000000e+00> : vector<4x4xf32>
    %33 = tpu.matmul %32, %0, %cst_36 {dimension_numbers = #tpu.dot_dimension_numbers<[1], [0], [0], [1], [0, 0, 1, 1], [], []>} : vector<4x8xf32>, vector<8x4xf32>, vector<4x4xf32> -> vector<4x4xf32>
    %34 = vector.broadcast %1 : vector<1x4xf32> to vector<4x4xf32>
    %35 = arith.addf %33, %34 : vector<4x4xf32>
    %c3_37 = arith.constant 3 : index
    %c0_38 = arith.constant 0 : index
    %c0_39 = arith.constant 0 : index
    %36 = vector.load %arg17[%c3_37, %c0_38, %c0_39] : memref<4x4x4xf32, #tpu.memory_space<vmem>>, vector<1x4x4xf32>
    %37 = vector.shape_cast %36 : vector<1x4x4xf32> to vector<4x4xf32>
    %38 = vector.shape_cast %35 : vector<4x4xf32> to vector<1x4x4xf32>
    tpu.vector_store %arg17[%c3_37, %c0_38, %c0_39], %38 {strides = array<i32>} : memref<4x4x4xf32, #tpu.memory_space<vmem>>, vector<1x4x4xf32>,
    %c0_i32 = arith.constant 0 : i32
    %c4_i32 = arith.constant 4 : i32
    %39 = arith.addi %c0_i32, %c4_i32 : i32
    %c1_i32 = arith.constant 1 : i32
    scf.for %arg18 = %c0_i32 to %39 step %c1_i32  : i32 {
      %c4_i32_41 = arith.constant 4 : i32
      %40 = arith.muli %arg1, %c4_i32_41 : i32
      %41 = arith.addi %40, %arg18 : i32
      %42 = arith.index_cast %41 : i32 to index
      %43 = memref.load %arg2[%42] : memref<8xi32, #tpu.memory_space<smem>>
      %44 = arith.index_cast %41 : i32 to index
      %45 = memref.load %arg3[%44] : memref<8xi32, #tpu.memory_space<smem>>
      %46 = arith.index_cast %41 : i32 to index
      %47 = memref.load %arg4[%46] : memref<8xf32, #tpu.memory_space<smem>>
      %48 = arith.index_cast %41 : i32 to index
      %49 = memref.load %arg5[%48] : memref<8xf32, #tpu.memory_space<smem>>
      %50 = arith.index_cast %43 : i32 to index
      %c0_42 = arith.constant 0 : index
      %c0_43 = arith.constant 0 : index
      %51 = vector.load %arg17[%50, %c0_42, %c0_43] : memref<4x4x4xf32, #tpu.memory_space<vmem>>, vector<1x4x4xf32>
      %52 = vector.shape_cast %51 : vector<1x4x4xf32> to vector<4x4xf32>
      %53 = vector.broadcast %47 : f32 to vector<4x4xf32>
      %54 = arith.mulf %53, %52 : vector<4x4xf32>
      %55 = arith.index_cast %45 : i32 to index
      %c0_44 = arith.constant 0 : index
      %c0_45 = arith.constant 0 : index
      %56 = vector.load %arg17[%55, %c0_44, %c0_45] : memref<4x4x4xf32, #tpu.memory_space<vmem>>, vector<1x4x4xf32>
      %57 = vector.shape_cast %56 : vector<1x4x4xf32> to vector<4x4xf32>
      %58 = vector.broadcast %49 : f32 to vector<4x4xf32>
      %59 = arith.mulf %58, %57 : vector<4x4xf32>
      %60 = arith.addf %54, %59 : vector<4x4xf32>
      %cst_46 = arith.constant dense<0.000000e+00> : vector<8x4xf32>
      %61 = tpu.matmul %4, %60, %cst_46 {dimension_numbers = #tpu.dot_dimension_numbers<[1], [0], [0], [1], [0, 0, 1, 1], [], []>} : vector<8x4xf32>, vector<4x4xf32>, vector<8x4xf32> -> vector<8x4xf32>
      %c0_47 = arith.constant 0 : index
      %62 = arith.index_cast %arg18 : i32 to index
      %c0_48 = arith.constant 0 : index
      %c0_49 = arith.constant 0 : index
      %c0_50 = arith.constant 0 : index
      %63 = vector.load %arg7[%c0_47, %62, %c0_48, %c0_49, %c0_50] : memref<1x4x1x8x8xf32, #tpu.memory_space<vmem>>, vector<1x1x1x8x8xf32>
      %64 = vector.shape_cast %63 : vector<1x1x1x8x8xf32> to vector<8x8xf32>
      %cst_51 = arith.constant dense<0.000000e+00> : vector<8x4xf32>
      %65 = tpu.matmul %64, %2, %cst_51 {dimension_numbers = #tpu.dot_dimension_numbers<[1], [0], [0], [1], [0, 0, 1, 1], [], []>} : vector<8x8xf32>, vector<8x4xf32>, vector<8x4xf32> -> vector<8x4xf32>
      %c0_52 = arith.constant 0 : index
      %66 = arith.index_cast %arg18 : i32 to index
      %c0_53 = arith.constant 0 : index
      %c0_54 = arith.constant 0 : index
      %c0_55 = arith.constant 0 : index
      %67 = vector.load %arg8[%c0_52, %66, %c0_53, %c0_54, %c0_55] : memref<1x4x1x8x8xf32, #tpu.memory_space<vmem>>, vector<1x1x1x8x8xf32>
      %68 = vector.shape_cast %67 : vector<1x1x1x8x8xf32> to vector<8x8xf32>
      %cst_56 = arith.constant dense<0.000000e+00> : vector<8x4xf32>
      %69 = tpu.matmul %68, %3, %cst_56 {dimension_numbers = #tpu.dot_dimension_numbers<[1], [0], [0], [1], [0, 0, 1, 1], [], []>} : vector<8x8xf32>, vector<8x4xf32>, vector<8x4xf32> -> vector<8x4xf32>
      %70 = arith.addf %65, %69 : vector<8x4xf32>
      %71 = arith.addf %70, %61 : vector<8x4xf32>
      %cst_57 = arith.constant 0.000000e+00 : f32
      %72 = vector.broadcast %cst_57 : f32 to vector<8x4xf32>
      %73 = arith.maximumf %71, %72 : vector<8x4xf32>
      %74 = vector.broadcast %5 : vector<1x4xf32> to vector<8x4xf32>
      %75 = arith.mulf %73, %74 : vector<8x4xf32>
      %cst_58 = arith.constant dense<0.000000e+00> : vector<8xf32>
      %76 = vector.multi_reduction <add>, %75, %cst_58 [1] : vector<8x4xf32> to vector<8xf32>
      %77 = vector.shape_cast %76 : vector<8xf32> to vector<8x1xf32>
      %78 = vector.broadcast %6 : f32 to vector<8x1xf32>
      %79 = arith.addf %77, %78 : vector<8x1xf32>
      %80 = arith.negf %79 : vector<8x1xf32>
      %81 = math.exp %80 : vector<8x1xf32>
      %cst_59 = arith.constant 1.000000e+00 : f32
      %82 = vector.broadcast %cst_59 : f32 to vector<8x1xf32>
      %83 = arith.addf %82, %81 : vector<8x1xf32>
      %84 = arith.divf %82, %83 : vector<8x1xf32>
      %c0_60 = arith.constant 0 : index
      %85 = arith.index_cast %arg18 : i32 to index
      %c0_61 = arith.constant 0 : index
      %c0_62 = arith.constant 0 : index
      %86 = vector.load %arg16[%c0_60, %85, %c0_61, %c0_62] : memref<1x4x8x1xf32, #tpu.memory_space<vmem>>, vector<1x1x8x1xf32>
      %87 = vector.shape_cast %86 : vector<1x1x8x1xf32> to vector<8x1xf32>
      %88 = vector.shape_cast %84 : vector<8x1xf32> to vector<1x1x8x1xf32>
      tpu.vector_store %arg16[%c0_60, %85, %c0_61, %c0_62], %88 {strides = array<i32>} : memref<1x4x8x1xf32, #tpu.memory_space<vmem>>, vector<1x1x8x1xf32>,
    }
    %c4_i32_40 = arith.constant 4 : i32
    return
  }
  func.func @transform_0(%arg0: i32, %arg1: i32, %arg2: memref<8xi32, #tpu.memory_space<smem>>, %arg3: memref<8xi32, #tpu.memory_space<smem>>, %arg4: memref<8xf32, #tpu.memory_space<smem>>, %arg5: memref<8xf32, #tpu.memory_space<smem>>, %arg6: memref<1xf32, #tpu.memory_space<smem>>) -> (i32, i32, i32, i32, i32) {
    %c0_i32 = arith.constant 0 : i32
    %c0_i32_0 = arith.constant 0 : i32
    %c0_i32_1 = arith.constant 0 : i32
    %c0_i32_2 = arith.constant 0 : i32
    return %arg0, %arg1, %c0_i32, %c0_i32_0, %c0_i32_1 : i32, i32, i32, i32, i32
  }
  func.func @transform_1(%arg0: i32, %arg1: i32, %arg2: memref<8xi32, #tpu.memory_space<smem>>, %arg3: memref<8xi32, #tpu.memory_space<smem>>, %arg4: memref<8xf32, #tpu.memory_space<smem>>, %arg5: memref<8xf32, #tpu.memory_space<smem>>, %arg6: memref<1xf32, #tpu.memory_space<smem>>) -> (i32, i32, i32, i32, i32) {
    %c1_i32 = arith.constant 1 : i32
    %c0_i32 = arith.constant 0 : i32
    %c0_i32_0 = arith.constant 0 : i32
    %c0_i32_1 = arith.constant 0 : i32
    return %arg0, %arg1, %c1_i32, %c0_i32, %c0_i32_0 : i32, i32, i32, i32, i32
  }
  func.func @transform_2(%arg0: i32, %arg1: i32, %arg2: memref<8xi32, #tpu.memory_space<smem>>, %arg3: memref<8xi32, #tpu.memory_space<smem>>, %arg4: memref<8xf32, #tpu.memory_space<smem>>, %arg5: memref<8xf32, #tpu.memory_space<smem>>, %arg6: memref<1xf32, #tpu.memory_space<smem>>) -> (i32, i32, i32, i32) {
    %c0_i32 = arith.constant 0 : i32
    %c0_i32_0 = arith.constant 0 : i32
    %c0_i32_1 = arith.constant 0 : i32
    %c0_i32_2 = arith.constant 0 : i32
    return %arg0, %c0_i32, %c0_i32_0, %c0_i32_1 : i32, i32, i32, i32
  }
  func.func @transform_3(%arg0: i32, %arg1: i32, %arg2: memref<8xi32, #tpu.memory_space<smem>>, %arg3: memref<8xi32, #tpu.memory_space<smem>>, %arg4: memref<8xf32, #tpu.memory_space<smem>>, %arg5: memref<8xf32, #tpu.memory_space<smem>>, %arg6: memref<1xf32, #tpu.memory_space<smem>>) -> (i32, i32) {
    %c0_i32 = arith.constant 0 : i32
    %c0_i32_0 = arith.constant 0 : i32
    %c0_i32_1 = arith.constant 0 : i32
    return %c0_i32, %c0_i32_0 : i32, i32
  }
  func.func @transform_4(%arg0: i32, %arg1: i32, %arg2: memref<8xi32, #tpu.memory_space<smem>>, %arg3: memref<8xi32, #tpu.memory_space<smem>>, %arg4: memref<8xf32, #tpu.memory_space<smem>>, %arg5: memref<8xf32, #tpu.memory_space<smem>>, %arg6: memref<1xf32, #tpu.memory_space<smem>>) -> (i32, i32) {
    %c0_i32 = arith.constant 0 : i32
    %c0_i32_0 = arith.constant 0 : i32
    %c0_i32_1 = arith.constant 0 : i32
    return %c0_i32, %c0_i32_0 : i32, i32
  }
  func.func @transform_5(%arg0: i32, %arg1: i32, %arg2: memref<8xi32, #tpu.memory_space<smem>>, %arg3: memref<8xi32, #tpu.memory_space<smem>>, %arg4: memref<8xf32, #tpu.memory_space<smem>>, %arg5: memref<8xf32, #tpu.memory_space<smem>>, %arg6: memref<1xf32, #tpu.memory_space<smem>>) -> (i32, i32) {
    %c0_i32 = arith.constant 0 : i32
    %c0_i32_0 = arith.constant 0 : i32
    %c0_i32_1 = arith.constant 0 : i32
    return %c0_i32, %c0_i32_0 : i32, i32
  }
  func.func @transform_6(%arg0: i32, %arg1: i32, %arg2: memref<8xi32, #tpu.memory_space<smem>>, %arg3: memref<8xi32, #tpu.memory_space<smem>>, %arg4: memref<8xf32, #tpu.memory_space<smem>>, %arg5: memref<8xf32, #tpu.memory_space<smem>>, %arg6: memref<1xf32, #tpu.memory_space<smem>>) -> (i32, i32) {
    %c0_i32 = arith.constant 0 : i32
    %c0_i32_0 = arith.constant 0 : i32
    %c0_i32_1 = arith.constant 0 : i32
    return %c0_i32, %c0_i32_0 : i32, i32
  }
  func.func @transform_7(%arg0: i32, %arg1: i32, %arg2: memref<8xi32, #tpu.memory_space<smem>>, %arg3: memref<8xi32, #tpu.memory_space<smem>>, %arg4: memref<8xf32, #tpu.memory_space<smem>>, %arg5: memref<8xf32, #tpu.memory_space<smem>>, %arg6: memref<1xf32, #tpu.memory_space<smem>>) -> (i32, i32) {
    %c0_i32 = arith.constant 0 : i32
    %c0_i32_0 = arith.constant 0 : i32
    %c0_i32_1 = arith.constant 0 : i32
    return %c0_i32, %c0_i32_0 : i32, i32
  }
  func.func @transform_8(%arg0: i32, %arg1: i32, %arg2: memref<8xi32, #tpu.memory_space<smem>>, %arg3: memref<8xi32, #tpu.memory_space<smem>>, %arg4: memref<8xf32, #tpu.memory_space<smem>>, %arg5: memref<8xf32, #tpu.memory_space<smem>>, %arg6: memref<1xf32, #tpu.memory_space<smem>>) -> (i32, i32) {
    %c0_i32 = arith.constant 0 : i32
    %c0_i32_0 = arith.constant 0 : i32
    %c0_i32_1 = arith.constant 0 : i32
    return %c0_i32, %c0_i32_0 : i32, i32
  }
  func.func @transform_9(%arg0: i32, %arg1: i32, %arg2: memref<8xi32, #tpu.memory_space<smem>>, %arg3: memref<8xi32, #tpu.memory_space<smem>>, %arg4: memref<8xf32, #tpu.memory_space<smem>>, %arg5: memref<8xf32, #tpu.memory_space<smem>>, %arg6: memref<1xf32, #tpu.memory_space<smem>>) -> (i32, i32, i32, i32) {
    %c0_i32 = arith.constant 0 : i32
    %c0_i32_0 = arith.constant 0 : i32
    %c0_i32_1 = arith.constant 0 : i32
    return %arg0, %arg1, %c0_i32, %c0_i32_0 : i32, i32, i32, i32
  }
}

</mosaic_0001>

<bundles_post_ra>
// kernel: tpu_custom_call.1
= control target key start
LH: loop header
LB: loop body
LE: loop exit
PB: predicated region body
PF: predicated region fallthrough
CT: control target
= control target key end

     0   :  { %s1941_s0 = inlined_call_operand.vmem [shape: s32[8], index: 0, kind: input, shape index: {}]   ;;  %s1942_s5 = inlined_call_operand.hbm [shape: f32[2,8,2,8,8], index: 5, kind: input, shape index: {}]   ;;  %s1943_s6 = inlined_call_operand.hbm [shape: f32[2,8,2,8,8], index: 6, kind: input, shape index: {}]   ;;  %s1944_s7 = inlined_call_operand.vmem [shape: f32[2,4,4,8], index: 7, kind: input, shape index: {}]   ;;  %s1945_s8 = inlined_call_operand.vmem [shape: f32[8,4], index: 8, kind: input, shape index: {}]   ;;  %s1946_s9 = inlined_call_operand.vmem [shape: f32[8,4], index: 9, kind: input, shape index: {}]   ;;  %s1947_s10 = inlined_call_operand.vmem [shape: f32[8,4], index: 10, kind: input, shape index: {}]   ;;  %s1948_s11 = inlined_call_operand.vmem [shape: f32[1,4], index: 11, kind: input, shape index: {}]   ;;  %s1949_s12 = inlined_call_operand.vmem [shape: f32[8,4], index: 12, kind: input, shape index: {}]   ;;  %s1950_s13 = inlined_call_operand.vmem [shape: f32[1,4], index: 13, kind: input, shape index: {}]   ;;  %s1951_s14 = inlined_call_operand.vmem [shape: f32[2,8,8,1], index: 14, kind: output, shape index: {}]   ;;  %s1952_s1 = inlined_call_operand.vmem [shape: s32[8], index: 1, kind: input, shape index: {}]   ;;  %s1953_s2 = inlined_call_operand.vmem [shape: f32[8], index: 2, kind: input, shape index: {}]   ;;  %s1954_s3 = inlined_call_operand.vmem [shape: f32[8], index: 3, kind: input, shape index: {}]   ;;  %s1955_s4 = inlined_call_operand.<no memory space> [shape: f32[1], index: 4, kind: input, shape index: {}]  }
   0x1   :  { %1962 = sst [smem:[#allocation22_spill]] %s1942_s5  ;;  %s19_s15 = sshll.u32 %s1941_s0, 4  ;;  %s20_s15 = int_to_ptr.vmem [resolvable:$true] %s19_s15 }
   0x2   :  { %1963 = sst [smem:[#allocation23_spill]] %s1947_s10  ;;  %s23_s18 = sshll.u32 %s1952_s1, 4  ;;  %s24_s18 = int_to_ptr.vmem [resolvable:$true] %s23_s18 }
   0x3   :  { %1964 = sst [smem:[#allocation24_spill]] %s1948_s11  ;;  %s1412_s19 = scalar_lea.vmem %s20_s15, 16 }
   0x4   :  { %p1413_p0 = scmp.ne.s32.totalorder %s20_s15, %s1412_s19  ;;  %p1417_p1 = scmp.lt.s32.totalorder %s20_s15, %s20_s15 }
   0x5   :  { %p1418_p2 = scmp.lt.s32.totalorder %s1412_s19, %s1412_s19 }
   0x7   :  { %p1419_p3 = por %p1418_p2, %p1417_p1 }
   0x9   :  { %p1420_p4 = pnand %p1419_p3, %p1413_p0 }
   0xb   :  { %1423 = shalt.err (!%p1420_p4)  }
   0xc   :  { %s1599_s20 = smov [#allocation4]   ;;  %s1424_s21 = scalar_lea.vmem %s24_s18, 16 }
   0xd   :  { %22 = dma.vmem_to_smem %s20_s15, 16, %s1599_s20, [#allocation3] }
   0xe   :  { %p1425_p5 = scmp.ne.s32.totalorder %s24_s18, %s1424_s21  ;;  %p1429_p6 = scmp.lt.s32.totalorder %s24_s18, %s24_s18 }
   0xf   :  { %p1430_p7 = scmp.lt.s32.totalorder %s1424_s21, %s1424_s21 }
  0x11   :  { %p1431_p8 = por %p1430_p7, %p1429_p6 }
  0x13   :  { %p1432_p9 = pnand %p1431_p8, %p1425_p5 }
  0x15   :  { %1435 = shalt.err (!%p1432_p9)  }
  0x16   :  { %s1600_s0 = smov [#allocation5]   ;;  %s27_s23 = sshll.u32 %s1953_s2, 4  ;;  %s28_s23 = int_to_ptr.vmem [resolvable:$true] %s27_s23 }
  0x17   :  { %26 = dma.vmem_to_smem %s24_s18, 16, %s1600_s0, [#allocation3] }
  0x18   :  { %s31_s26 = sshll.u32 %s1954_s3, 4  ;;  %s1436_s27 = scalar_lea.vmem %s28_s23, 16  ;;  %s32_s26 = int_to_ptr.vmem [resolvable:$true] %s31_s26 }
  0x19   :  { %p1437_p10 = scmp.ne.s32.totalorder %s28_s23, %s1436_s27  ;;  %p1441_p11 = scmp.lt.s32.totalorder %s28_s23, %s28_s23 }
  0x1a   :  { %p1442_p12 = scmp.lt.s32.totalorder %s1436_s27, %s1436_s27 }
  0x1c   :  { %p1443_p13 = por %p1442_p12, %p1441_p11 }
  0x1e   :  { %p1444_p0 = pnand %p1443_p13, %p1437_p10 }
  0x20   :  { %1447 = shalt.err (!%p1444_p0)  }
  0x21   :  { %s1601_s28 = smov [#allocation6]   ;;  %s1448_s29 = scalar_lea.vmem %s32_s26, 16 }
  0x22   :  { %30 = dma.vmem_to_smem %s28_s23, 16, %s1601_s28, [#allocation3] }
  0x23   :  { %p1449_p1 = scmp.ne.s32.totalorder %s32_s26, %s1448_s29  ;;  %p1453_p2 = scmp.lt.s32.totalorder %s32_s26, %s32_s26 }
  0x24   :  { %p1454_p3 = scmp.lt.s32.totalorder %s1448_s29, %s1448_s29 }
  0x26   :  { %p1455_p4 = por %p1454_p3, %p1453_p2 }
  0x28   :  { %p1456_p5 = pnand %p1455_p4, %p1449_p1 }
  0x2a   :  { %1459 = shalt.err (!%p1456_p5)  }
  0x2b   :  { %s1602_s2 = smov [#allocation7]   ;;  %35 = sst [smem:[#allocation8]] %s1955_s4 }
  0x2c   :  { %34 = dma.vmem_to_smem %s32_s26, 16, %s1602_s2, [#allocation3] }
  0x2d   :  { %1553 = dma.done.wait [#allocation3], 64 }
  0x2e   :  { %1554 = vsyncadd [#allocation3], 4294967232 }
  0x2f   :  { %37 = sfence }
  0x30   :  { %38 = vsyncpa [#allocation10], 0 }
  0x31   :  { %40 = vsyncpa [#allocation10 + $0x1], 0 }
  0x32   :  { %41 = vsyncpa [#allocation12], 0 }
  0x33   :  { %43 = vsyncpa [#allocation12 + $0x1], 0  ;;  %s1702_s15 = smov 0   ;;  %s1704_s16 = smov 0  }
  0x34   :  { %s1706_s17 = smov 0   ;;  %s1708_s18 = smov 0  }
  0x35   :  { %s1710_s19 = smov 0   ;;  %s1712_s20 = smov 0  }
  0x36   :  { %s1714_s4 = smov 0   ;;  %s1716_s21 = smov 0  }
  0x37 LB: > { %1965 = sst [smem:[#allocation16_spill]] %s1573_s17  ;;  %s1221_s0 = sadd.s32 4294967295, %s1593_s21   ;;  %s1593_s21 = sphi %s1716_s21, %s49_s21   ;;  %s1589_s4 = sphi %s1714_s4, %s1984_s4   ;;  %s1585_s20 = sphi %s1712_s20, %s1983_s20   ;;  %s1581_s19 = sphi %s1710_s19, %s1982_s19   ;;  %s1577_s18 = sphi %s1708_s18, %s1987_s18   ;;  %s1573_s17 = sphi %s1706_s17, %s1980_s17   ;;  %s1569_s16 = sphi %s1704_s16, %s1986_s16   ;;  %s1565_s15 = sphi %s1702_s15, %s1985_s15  }
  0x38   : > { %1966 = sst [smem:[#allocation17_spill]] %s1585_s20  ;;  %s58_s1 = sadd.s32 1, %s1585_s20 }
  0x39   : > { %1967 = sst [smem:[#allocation18_spill]] %s1589_s4  ;;  %p59_p6 = scmp.ge.s32.totalorder %s58_s1, 2 }
  0x3a   : > { %s61_s22 = sadd.s32 1, %s1589_s4  ;;  %s70_s23 = sadd.s32 1, %s1573_s17 }
  0x3b   : > { %p77_p7 = scmp.ne.s32.totalorder %s1573_s17, %s1569_s16  ;;  %s1989_s1 = smov (%p59_p6, %s58_s1), 0 }
  0x3c   : > { %1968 = sst [smem:[#allocation19_spill]] %s1989_s1  ;;  %s1991_s22 = smov (!%p59_p6, %s61_s22), %s1589_s4 }
  0x3d   : > { %s66_s24 = ssub.s32 %s1585_s20, %s1989_s1  ;;  %p78_p8 = scmp.eq.s32.totalorder %s1593_s21, 0 }
  0x3e   : > { %p63_p9 = scmp.ge.s32.totalorder %s1991_s22, 2  ;;  %p83_p10 = scmp.ne.s32.totalorder %s1569_s16, %s1565_s15 }
  0x3f   : > { %p1753_p11 = por %p78_p8, %p77_p7  ;;  %p84_p12 = scmp.eq.s32.totalorder %s1221_s0, 0 }
  0x40   : > { %s1993_s22 = smov (%p63_p9, %s1991_s22), 0  ;;  %p1324_p0 = scmp.lt.s32.totalorder %s1593_s21, 4 }
  0x41   : > { %1970 = sst [smem:[#allocation20_spill]] %s1993_s22  ;;  %p1759_p13 = por %p84_p12, %p83_p10 }
  0x42   : > { %s65_s27 = ssub.s32 %s1589_s4, %s1993_s22  ;;  %s1767_s29 = sand.u32 1, %s1573_s17  }
  0x43   : > { %s67_s28 = sor.u32 %s66_s24, %s65_s27  ;;  %s1958_s2 = sshll.u32 %s1767_s29, 5 }
  0x44   : > { %p68_p1 = scmp.eq.s32.totalorder %s67_s28, 0  ;;  %s1262_s3 = sshll.u32 %s1585_s20, 3 }
  0x45   : > { %s1228_s15 = sshll.u32 %s1589_s4, 4  ;;  %s337_s1 = scalar_lea.vmem [#allocation9], %s1958_s2 }
  0x46   : > { %s1772_s30 = scalar_select %p68_p1, %s1573_s17, %s70_s23  }
  0x47   : > { %s1775_s0 = sadd.s32 %s1262_s3, %s1228_s15  ;;  %s347_s11 = sshll.u32 %s337_s1, 4  ;;  %s348_s11 = int_to_ptr.vmem [resolvable:$true] %s347_s11 }
  0x48   : > { %1972 = sst [smem:[#allocation21_spill]] %s1772_s30  ;;  %s1229_s22 = sshll.u32 %s1775_s0, 7 }
  0x49   : > { %s1973_s5 = sld [smem:[#allocation22_spill]]  ;;  %p1787_p2 = pnand %p1324_p0, %p1753_p11 }
  0x4a   : > { %s334_s23 = scalar_lea.sflag [#allocation10], %s1767_s29  ;;  %s1473_s3 = scalar_lea.vmem %s348_s11, 512 }
  0x4b   : > { %p1462_p3 = pneg %p1787_p2  ;;  %p1474_p4 = scmp.ne.s32.totalorder %s348_s11, %s1473_s3 }
  0x4c   : > { %s1603_s1 = smov [#allocation9]  }
  0x4d   : > { %p1476_p5 = pnand %p1474_p4, %p1462_p3  ;;  %s1478_s15 = sshll.u32 %s1603_s1, 4  ;;  %s1479_s15 = int_to_ptr.vmem [resolvable:$false] %s1478_s15 }
  0x4e   : > { %s1480_s25 = scalar_lea.vmem %s1479_s15, 1024  ;;  %p1481_p7 = scmp.lt.s32.totalorder %s348_s11, %s1479_s15 }
  0x4f   : > { %s346_s10 = scalar_lea.hbm %s1973_s5, %s1229_s22  ;;  %p1477_p6 = pneg %p1476_p5 }
  0x50   : > { %p1482_p8 = scmp.lt.s32.totalorder %s1480_s25, %s1473_s3 }
  0x52   : > { %p1483_p9 = por %p1482_p8, %p1481_p7 }
  0x54   : > { %p1484_p10 = pnand %p1483_p9, %p1477_p6 }
  0x56   : > { %1487 = shalt.err (!%p1484_p10)
}
  0x57   : > { %s1604_s0 = smov 256   ;;  %s1605_s24 = smov 128  }
  0x58   : > { %s1606_s27 = smov 8   ;;  %p1234_p11 = scmp.ge.s32.totalorder %s1593_s21, 1 }
  0x59   : > { %1320 = dma.hbm_to_vmem [thread:$0]  (!%p1787_p2), %s346_s10, 512, %s348_s11, %s334_s23, %s1604_s0, %s1605_s24, %s1606_s27  }
  0x5a   : > { %p388_p12 = scmp.lt.s32.totalorder %s1593_s21, 5  ;;  %s1120_s25 = scalar_lea.hbm %s1943_s6, %s1229_s22 }
  0x5b   : > { %s1121_s2 = scalar_lea.hbm %s1120_s25, 128  ;;  %s1976_s5 = sshll.u32 %s1767_s29, 5 }
  0x5c   : > { %p1803_p0 = pnand %p1234_p11, %p388_p12  ;;  %s361_s4 = scalar_lea.vmem [#allocation11], %s1976_s5 }
  0x5d   : > { %s372_s20 = sshll.u32 %s361_s4, 4  ;;  %s358_s30 = scalar_lea.sflag [#allocation12], %s1767_s29  ;;  %s373_s20 = int_to_ptr.vmem [resolvable:$true] %s372_s20 }
  0x5e   : > { %s1501_s17 = scalar_lea.vmem %s373_s20, 512  ;;  %s1607_s10 = smov [#allocation11]  }
  0x5f   : > { %p1502_p1 = scmp.ne.s32.totalorder %s373_s20, %s1501_s17  ;;  %s1506_s11 = sshll.u32 %s1607_s10, 4  ;;  %s1507_s11 = int_to_ptr.vmem [resolvable:$false] %s1506_s11 }
  0x60   : > { %s1508_s23 = scalar_lea.vmem %s1507_s11, 1024  ;;  %p1509_p6 = scmp.lt.s32.totalorder %s373_s20, %s1507_s11 }
  0x61   : > { %p1504_p4 = pnand %p1502_p1, %p1462_p3  ;;  %p1510_p7 = scmp.lt.s32.totalorder %s1508_s23, %s1501_s17 }
  0x63   : > { %p1505_p5 = pneg %p1504_p4  ;;  %p1511_p8 = por %p1510_p7, %p1509_p6 }
  0x65   : > { %p1512_p9 = pnand %p1511_p8, %p1505_p5 }
  0x67   : > { %1515 = shalt.err (!%p1512_p9)
}
  0x68   : > { %1323 = dma.hbm_to_vmem [thread:$0]  (!%p1787_p2), %s1121_s2, 512, %s373_s20, %s358_s30, %s1604_s0, %s1605_s24, %s1606_s27  }
  0x69   : > { %392 = sbr.rel (%p1803_p0) target bundleno = 718 (0x2ce), region = 56  ;;  %s394_s5 = sand.u32 (!%p1803_p0), 1, %s1569_s16  }
  0x6a   : > { %s1235_s4 = sshll.u32 (!%p1803_p0), %s394_s5, 5  ;;  %s395_s22 = scalar_lea.sflag (!%p1803_p0), [#allocation10], %s394_s5 }
  0x6b   : > { %s1823_s29 = scalar_lea.vmem (!%p1803_p0), [#allocation9], %s1235_s4 }
  0x6e   : > { %1556 = dma.done.wait (%p1759_p13), %s395_s22, 512  }
  0x6f   : > { %1558 = vsyncadd (%p1759_p13), %s395_s22, 4294966784  ;;  %s404_s17 = scalar_lea.sflag [#allocation12], %s394_s5  ;;  %s1829_s28 = scalar_lea.vmem [#allocation11], %s1235_s4 }
  0x70   : > { %1560 = dma.done.wait (%p1759_p13), %s404_s17, 512  }
  0x71   : > { %1562 = vsyncadd (%p1759_p13), %s404_s17, 4294966784  ;;  %p458_p2 = scmp.lt.s32.totalorder %s1581_s19, 1  ;;  %s1837_s20 = sshll.u32 %s1577_s18, 2  ;;  %v1608_v0 = vmov 0.0   ;;  %vm1609_vm0 = vmmov 0   ;;  %v1852_v1 = vld [vmem:[%s1945_s8] sm:$0xff] }
  0x72   : > { %s1839_s2 = sld [smem:[#allocation8]]  ;;  %1278 = vmatprep.subr.mxu0 %v1608_v0  ;;  %1283 = vmatprep.subr.mxu1 %v1608_v0  ;;  %p466_p3 = scmp.lt.s32.totalorder %s1837_s20, 7  ;;  %v1857_v2 = vld [vmem:[%s1946_s9] sm:$0xff]  ;;  %vm487_vm1 = vcmask 64512   ;;  %vm561_vm2 = vcmask 27648  }
  0x73   : > { %1280 = vmatprep.mubr.msk.f32.mxu0 %vm1609_vm0, %v1608_v0  ;;  %1285 = vmatprep.mubr.msk.f32.mxu1 %vm1609_vm0, %v1608_v0  ;;  %s1995_s19 = smov (!%p458_p2, %s1581_s19), 1  ;;  %v1862_v3 = vld [vmem:[%s1949_s12] sm:$0xff]  ;;  %s1977_s24 = sld [smem:[#allocation23_spill]] }
  0x74   : > { %s467_s26 = scalar_select %p466_p3, %s1837_s20, 7  ;;  %v1872_v4 = vld [vmem:[%s1950_s13] ss:$0 sm:$0xff] }
  0x75   : > { %s1263_s30 = sshll.u32 %s1995_s19, 4  ;;  %s1240_s0 = sshll.u32 %s1995_s19, 3 }
  0x76   : > { %s462_s27 = scalar_lea.vmem %s1944_s7, %s1263_s30  ;;  %s469_s3 = sadd.s32 %s1240_s0, %s467_s26 }
  0x77   : > { %s1241_s1 = sshll.u32 %s469_s3, 3  ;;  %v480_v6 = vld [vmem:[%s462_s27] sm:$0xf]  ;;  %v1244_v7 = vld [vmem:[%s462_s27 + $0x4] sm:$0xf] }
  0x78   : > { %s1867_s22 = scalar_lea.vmem %s1951_s14, %s1241_s1  ;;  %v1246_v8 = vld [vmem:[%s462_s27 + $0x8] sm:$0xf]  ;;  %v1248_v9 = vld [vmem:[%s462_s27 + $0xc] sm:$0xf]  ;;  %s1978_s1 = sld [smem:[#allocation24_spill]] }
  0x79   : > { %v473_v5 = vld [vmem:[%s1977_s24] sm:$0xff]  ;;  %s1886_s27 = smov 0  }
  0x7a   : > { %1279 = vmatpush3.msra.mxu0 %v473_v5  ;;  %1284 = vmatpush3.msra.mxu1 %v473_v5 }
  0x7b   : > { %1281 = vmatmul.mubr.msk.f32.vlgmr.msra.gmra.mxu0 %vm487_vm1, %v480_v6  ;;  %1286 = vmatmul.mubr.msk.f32.vlgmr.msra.gmra.mxu1 %vm487_vm1, %v1244_v7 }
  0x7c   : > { %1288 = vmatprep.subr.mxu0 %v1608_v0  ;;  %1293 = vmatprep.subr.mxu1 %v1608_v0 }
  0x7d   : > { %1289 = vmatpush3.msra.mxu0 %v473_v5  ;;  %1294 = vmatpush3.msra.mxu1 %v473_v5 }
  0x7e   : > { %1290 = vmatprep.mubr.msk.f32.mxu0 %vm1609_vm0, %v1608_v0  ;;  %1295 = vmatprep.mubr.msk.f32.mxu1 %vm1609_vm0, %v1608_v0  ;;  %v1242_v10 = vld [vmem:[%s1978_s1] ss:$0 sm:$0xff] }
  0x7f   : > { %1291 = vmatmul.mubr.msk.f32.vlgmr.msra.gmra.mxu0 %vm487_vm1, %v1246_v8  ;;  %1296 = vmatmul.mubr.msk.f32.vlgmr.msra.gmra.mxu1 %vm487_vm1, %v1248_v9 }
 0x13b   : > { %v557_v11 = vpop.f32.mrf.mxu0  ;;  %v634_v12 = vpop.f32.mrf.mxu1 }
 0x13c   : > { %v558_v13 = vadd.f32 %v1242_v10, %v557_v11  ;;  %v635_v14 = vadd.f32 %v1242_v10, %v634_v12 }
 0x13d   : > { %v1282_v15 = vpop.f32.mrf.mxu0  ;;  %v1287_v16 = vpop.f32.mrf.mxu1 }
 0x13e   : > { %562 = vst.msk [vmem:[#allocation2] sm:$0xf] %vm561_vm2, %v558_v13  ;;  %639 = vst.msk [vmem:[#allocation2 + $0x4] sm:$0xf] %vm561_vm2, %v635_v14 }
 0x13f   : > { %v711_v17 = vpop.f32.mrf.mxu0  ;;  %v788_v18 = vpop.f32.mrf.mxu1 }
 0x140   : > { %v712_v19 = vadd.f32 %v1242_v10, %v711_v17  ;;  %v789_v20 = vadd.f32 %v1242_v10, %v788_v18 }
 0x141   : > { %v1292_v21 = vpop.f32.mrf.mxu0  ;;  %v1297_v22 = vpop.f32.mrf.mxu1 }
 0x142   : > { %716 = vst.msk [vmem:[#allocation2 + $0x8] sm:$0xf] %vm561_vm2, %v712_v19  ;;  %793 = vst.msk [vmem:[#allocation2 + $0xc] sm:$0xf] %vm561_vm2, %v789_v20 }
 0x143 LB: >> { %v1610_v23 = vmov 0.0   ;;  %vm1611_vm3 = vmmov 0   ;;  %s801_s15 = sadd.s32 %s1597_s27, %s1837_s20  ;;  %s1896_s25 = sshll.u32 %s1597_s27, 3  ;;  %vm821_vm4 = vcmask 1043456   ;;  %vm817_vm5 = vcmask 31744   ;;  %s1597_s27 = sphi %s1886_s27, %s799_s27  }
 0x144   : >> { %1298 = vmatprep.subr.mxu0 %v1610_v23  ;;  %1300 = vmatprep.mubr.msk.f32.mxu0 %vm1611_vm3, %v1610_v23  ;;  %s802_s10 = sld [smem:[#allocation4 + %s801_s15]]  ;;  %s898_s11 = scalar_lea.vmem %s1829_s28, %s1896_s25 [#allocation11]  ;;  %v1058_v44 = vstv %s1839_s2  ;;  %vm1067_vm6 = vcmask 7168  }
 0x145   : >> { %1303 = vmatprep.subr.mxu1 %v1610_v23  ;;  %1305 = vmatprep.mubr.msk.f32.mxu1 %vm1611_vm3, %v1610_v23  ;;  %s803_s23 = sld [smem:[#allocation5 + %s801_s15]]  ;;  %v899_v24 = vld [vmem:[%s898_s11] sm:$0xff]  ;;  %s896_s0 = scalar_lea.vmem %s1823_s29, %s1896_s25 [#allocation9] }
 0x146   : >> { %1304 = vmatpush3.msra.mxu1 %v1857_v2  ;;  %s804_s5 = sld [smem:[#allocation6 + %s801_s15]]  ;;  %v897_v32 = vld [vmem:[%s896_s0] sm:$0xff]  ;;  %s1066_s24 = scalar_lea.vmem %s1867_s22, %s1896_s25 }
 0x147   : >> { %1306 = vmatmul.mubr.msk.f32.vlgmr.msra.gmra.mxu1 %vm487_vm1, %v899_v24  ;;  %s805_s19 = sld [smem:[#allocation7 + %s801_s15]]  ;;  %s799_s27 = sadd.s32 1, %s1597_s27  }
 0x148   : >> { %p796_p13 = scmp.ge.s32.totalorder %s799_s27, 4  }
 0x14a   : >> { %s1251_s4 = sshll.u32 %s802_s10, 2 }
 0x14b   : >> { %s1252_s17 = sshll.u32 %s803_s23, 2  ;;  %s807_s26 = scalar_lea.vmem [#allocation2], %s1251_s4 }
 0x14c   : >> { %v808_v25 = vld [vmem:[%s807_s26] sm:$0xf]  ;;  %v809_v26 = vstv %s804_s5  ;;  %s812_s30 = scalar_lea.vmem [#allocation2], %s1252_s17 }
 0x14d   : >> { %v810_v27 = vmul.f32 %v809_v26, %v808_v25  ;;  %v813_v28 = vld [vmem:[%s812_s30] sm:$0xf]  ;;  %v814_v29 = vstv %s805_s19 }
 0x14e   : >> { %v815_v30 = vmul.f32 %v814_v29, %v813_v28 }
 0x150   : >> { %v816_v31 = vadd.f32 %v815_v30, %v810_v27 }
 0x152   : >> { %1299 = vmatpush3.msk.msra.mxu0 %vm821_vm4, %v816_v31 }
 0x153   : >> { %1301 = vmatmul.mubr.msk.f32.vlgmr.msra.gmra.mxu0 %vm817_vm5, %v1862_v3  ;;  %1308 = vmatprep.subr.mxu0 %v1610_v23 }
 0x154   : >> { %1309 = vmatpush3.msra.mxu0 %v1852_v1  ;;  %1310 = vmatprep.mubr.msk.f32.mxu0 %vm1611_vm3, %v1610_v23 }
 0x157   : >> { %1311 = vmatmul.mubr.msk.f32.vlgmr.msra.gmra.mxu0 %vm487_vm1, %v897_v32 }
 0x207   : >> { %v969_v33 = vpop.f32.mrf.mxu1 }
 0x209   : >> { %v1307_v34 = vpop.f32.mrf.mxu1 }
 0x213   : >> { %v891_v35 = vpop.f32.mrf.mxu0 }
 0x215   : >> { %v1302_v36 = vpop.f32.mrf.mxu0 }
 0x217   : >> { %v1042_v37 = vpop.f32.mrf.mxu0 }
 0x218   : >> { %v1043_v38 = vadd.f32 %v1042_v37, %v969_v33 }
 0x219   : >> { %v1312_v39 = vpop.f32.mrf.mxu0 }
 0x21a   : >> { %v1046_v40 = vadd.f32 %v1043_v38, %v891_v35 }
 0x21c   : >> { %v1047_v41 = vmax.f32 %v1046_v40, 0.0 }
 0x21e   : >> { %v1054_v42 = vmul.f32 %v1872_v4, %v1047_v41 }
 0x220   : >> { %v1055_v43 = vsel %vm817_vm5, %v1054_v42, 0.0 }
 0x221   : >> { %1056 = vadd.xlane.f32.xlu0 %v1055_v43 }
 0x2aa   : >> { %v1057_v45 = vpop.xlane.xlu0 %1056 }
 0x2ab   : >> { %v1059_v46 = vadd.f32 %v1058_v44, %v1057_v45 }
 0x2ad   : >> { %v1259_v47 = vmul.f32 -1.442695, %v1059_v46 }
 0x2af   : >> { %1408 = vpow2.f32 %v1259_v47 }
 0x2bc   : >> { %v1409_v48 = vpop.eup %1408 }
 0x2bd   : >> { %v1063_v49 = vadd.f32 1.0, %v1409_v48 }
 0x2bf   : >> { %1410 = vrcp.f32 %v1063_v49 }
 0x2c9   : > { %798 = sbr.rel (!%p796_p13) target bundleno = 323 (0x143), region = 130 }
 0x2cc   : >> { %v1411_v50 = vpop.eup %1410 }
 0x2cd   : >> { %1068 = vst.msk [vmem:[%s1066_s24] sm:$0xff] %vm1067_vm6, %v1411_v50 }
 0x2ce PF: > { %s49_s21 = sadd.s32 1, %s1593_s21   ;;  %s1979_s18 = sld [smem:[#allocation16_spill]] }
 0x2cf   : > { %p46_p10 = scmp.ge.s32.totalorder %s49_s21, 6   ;;  %s1980_s17 = sld [smem:[#allocation21_spill]] }
 0x2d0   : > { %s1981_s3 = sld [smem:[#allocation17_spill]]  ;;  %s1985_s15 = smov %s1569_s16 }
 0x2d1   : > { %s1982_s19 = sld [smem:[#allocation18_spill]] }
 0x2d2   : > { %s1983_s20 = sld [smem:[#allocation19_spill]]  ;;  %48 = sbr.rel (!%p46_p10) target bundleno = 55 (0x37), region = 141 }
 0x2d3   : > { %s1984_s4 = sld [smem:[#allocation20_spill]] }
 0x2d4   : > { %s1986_s16 = smov %s1979_s18 }
 0x2d6   : > { %s1987_s18 = smov %s1981_s3 }
 0x2d7   :  { %1099 = vsyncpa [#allocation10], 1 }
 0x2d8   :  { %1101 = vsyncpa [#allocation10 + $0x1], 1 }
 0x2d9   :  { %1102 = vsyncpa [#allocation12], 1 }
 0x2da   :  { %1104 = vsyncpa [#allocation12 + $0x1], 1 }

</bundles_post_ra>
